<compile_context>
chip_gen: v7x
topology: tpu7x:2x2x1
jax: 0.10.0
libtpu: 0.0.40
codegen_flags: <defaults>
</compile_context>

<pallas_src>
import jax
import jax.numpy as jnp
from jax.experimental import pallas as pl
from jax.experimental.pallas import tpu as pltpu


def _round_up(v, m):
    return ((v + m - 1) // m) * m


def flow_head_pallas(x_nchw, w1, b1, w2, b2, *, compute_dtype=jnp.bfloat16):
    """x_nchw: (B, Cin, H, W); w1: (Chid, Cin, 3, 3); w2: (Cout, Chid, 3, 3)."""
    B, Cin, H, W = x_nchw.shape
    Chid = w1.shape[0]
    Cout = w2.shape[0]
    HW = H * W
    # Flat circular-pad length: >= HW + 2W so row-over/underflow lands in the
    # zero tail (under-flow wraps around to it), rounded to a 128-lane multiple.
    L = _round_up(HW + 2 * W, 128)

    # ---- tiny one-time weight / bias / mask prep (host-side, constant) -----
    # w1 (O, I, ky, kx) -> (O, ky, kx, I) -> (Chid, 9*Cin): matches slab rows
    # k*Cin + ci with k = ky*3 + kx.
    w1_k = jnp.transpose(w1, (0, 2, 3, 1)).reshape(Chid, 9 * Cin).astype(compute_dtype)
    # w2 (O, I, ky, kx) -> (ky, kx, O, I) -> (9*Cout, Chid): row k*Cout + co.
    w2_k = jnp.transpose(w2, (2, 3, 0, 1)).reshape(9 * Cout, Chid).astype(compute_dtype)
    b1_k = b1.reshape(Chid, 1).astype(jnp.float32)
    b2_k = b2.reshape(Cout, 1).astype(jnp.float32)

    # Column / interior masks over the flat padded index (3, L), f32:
    #   row 0: 0 where col == 0      (needed for dx = -1 taps)
    #   row 1: 0 where col == W - 1  (needed for dx = +1 taps)
    #   row 2: 1 on the data region [0, HW), 0 on the pad tail
    idx = jnp.arange(L, dtype=jnp.int32)
    col = idx % W
    masks = jnp.stack([
        (col > 0).astype(jnp.float32),
        (col < W - 1).astype(jnp.float32),
        (idx < HW).astype(jnp.float32),
    ], axis=0)

    # Input stays in its own dtype; metadata-only reshape (no cast, no pad).
    x_flat = x_nchw.reshape(B, Cin, HW)

    def kernel(x_ref, w1_ref, b1_ref, w2_ref, b2_ref, m_ref,
               out_ref, xp_ref, im_ref):
        # Zero the circular-pad tail every step (tiny: Cin x (L-HW)).  Not
        # hoisted under pl.when(program_id == 0): with a "parallel" batch axis
        # a second TensorCore (v7x) never sees program_id 0 and would read
        # garbage from its own, separate scratch.
        xp_ref[:, HW:] = jnp.zeros((Cin, L - HW), xp_ref.dtype)
        # Lane-aligned (offset-0) store of the input block; dtype cast happens
        # here, after the DMA, not in the wrapper (no extra HBM pass over x).
        xp_ref[:, :HW] = x_ref[...].astype(xp_ref.dtype)

        xp = xp_ref[...]                                 # (Cin, L)
        m_left = m_ref[0:1, :]
        m_right = m_ref[1:2, :]
        m_left_c = m_left.astype(xp.dtype)               # hoisted casts
        m_right_c = m_right.astype(xp.dtype)

        # ---- im2col slab: tap (ky,kx) == flat shift by (ky-1)*W+(kx-1) -----
        for ky in range(3):
            for kx in range(3):
                k = ky * 3 + kx
                s = (ky - 1) * W + (kx - 1)
                t = xp if s == 0 else pltpu.roll(xp, shift=(-s) % L, axis=1)
                if kx == 0:
                    t = t * m_left_c                     # mask wrapped column 0
                elif kx == 2:
                    t = t * m_right_c                    # mask wrapped column W-1
                im_ref[k * Cin:(k + 1) * Cin, :] = t     # sublane-aligned store

        # ---- conv1: single MXU matmul, K = 9*Cin, f32 accumulation ---------
        acc1 = jnp.dot(w1_ref[...], im_ref[...],
                       preferred_element_type=jnp.float32)           # (Chid, L)
        hid = jnp.maximum(acc1 + b1_ref[...], 0.0) * m_ref[2:3, :]   # zero pad tail
        hid = hid.astype(w2_ref.dtype)

        # ---- conv2: one wide matmul of per-tap products, then roll+mask add -
        p = jnp.dot(w2_ref[...], hid,
                    preferred_element_type=jnp.float32)              # (9*Cout, L)
        acc2 = jnp.zeros((Cout, L), jnp.float32)
        for ky in range(3):
            for kx in range(3):
                k = ky * 3 + kx
                s = (ky - 1) * W + (kx - 1)
                pk = p[k * Cout:(k + 1) * Cout, :]
                t = pk if s == 0 else pltpu.roll(pk, shift=(-s) % L, axis=1)
                if kx == 0:
                    t = t * m_left
                elif kx == 2:
                    t = t * m_right
                acc2 = acc2 + t                                       # only Cout=2 rows

        out_ref[...] = (acc2[:, :HW] + b2_ref[...]).astype(out_ref.dtype)

    # ---- VMEM budget with (8,128) layout rounding ---------------------------
    def r8(v):
        return _round_up(v, 8)

    cb = jnp.dtype(compute_dtype).itemsize
    xb = jnp.dtype(x_nchw.dtype).itemsize
    HWr = _round_up(HW, 128)
    vmem_est = (
        2 * r8(Cin) * HWr * xb                       # x block (double-buffered)
        + 2 * r8(Cout) * HWr * 4                     # out block (double-buffered)
        + r8(Cin) * L * cb                           # flat padded-x scratch
        + r8(9 * Cin) * L * cb                       # im2col slab scratch
        + 2 * r8(Chid) * _round_up(9 * Cin, 128) * cb    # w1 (dbl-buf)
        + 2 * r8(9 * Cout) * _round_up(Chid, 128) * cb   # w2 (dbl-buf)
        + 2 * r8(3) * L * 4                          # masks (dbl-buf)
        + 4 * r8(Chid) * 128 * 4                     # biases (lane-padded)
        + 2 * r8(Chid) * L * 4                       # acc1 + hid (f32, live)
        + r8(Chid) * L * cb                          # hid cast for conv2
        + r8(9 * Cout) * L * 4                       # p (conv2 tap products)
        + r8(Cout) * L * 4                           # conv2 accumulator
        + 2 * r8(Cin) * L * cb                       # transient rolled copies
    )
    cap = 128 * 1024 * 1024
    try:  # query actual per-core VMEM (64 MiB on v7x, 128 MiB on v5e/v6e)
        cap = int(getattr(pltpu.get_tpu_info(), "vmem_capacity_bytes", cap))
    except Exception:
        pass
    vmem_limit = int(min(int(0.9 * cap),
                         max(32 * 1024 * 1024, int(1.25 * vmem_est))))

    out_flat = pl.pallas_call(
        kernel,
        out_shape=jax.ShapeDtypeStruct((B, Cout, HW), jnp.float32),
        grid=(B,),
        in_specs=[
            pl.BlockSpec((None, Cin, HW), lambda b: (b, 0, 0)),
            pl.BlockSpec((Chid, 9 * Cin), lambda b: (0, 0)),
            pl.BlockSpec((Chid, 1), lambda b: (0, 0)),
            pl.BlockSpec((9 * Cout, Chid), lambda b: (0, 0)),
            pl.BlockSpec((Cout, 1), lambda b: (0, 0)),
            pl.BlockSpec((3, L), lambda b: (0, 0)),
        ],
        out_specs=pl.BlockSpec((None, Cout, HW), lambda b: (b, 0, 0)),
        scratch_shapes=[
            pltpu.VMEM((Cin, L), compute_dtype),          # flat padded input
            pltpu.VMEM((9 * Cin, L), compute_dtype),      # im2col slab
        ],
        compiler_params=pltpu.CompilerParams(
            dimension_semantics=("parallel",),
            vmem_limit_bytes=vmem_limit),
    )(x_flat, w1_k, b1_k, w2_k, b2_k, masks)

    return out_flat.reshape(B, Cout, H, W)               # metadata-only reshape


def _reference_flow_head(x_nchw, w1, b1, w2, b2):
    """Pure-JAX reference (NCHW convs) for verification."""
    dn = jax.lax.conv_dimension_numbers(x_nchw.shape, w1.shape,
                                        ("NCHW", "OIHW", "NCHW"))
    h = jax.lax.conv_general_dilated(x_nchw, w1, (1, 1), ((1, 1), (1, 1)),
                                     dimension_numbers=dn)
    h = jnp.maximum(h + b1.reshape(1, -1, 1, 1), 0.0)
    dn2 = jax.lax.conv_dimension_numbers(h.shape, w2.shape,
                                         ("NCHW", "OIHW", "NCHW"))
    o = jax.lax.conv_general_dilated(h, w2, (1, 1), ((1, 1), (1, 1)),
                                     dimension_numbers=dn2)
    return o + b2.reshape(1, -1, 1, 1)


if __name__ == "__main__":
    # Small shapes consistent with FlowHead(input_dim, hidden_dim).
    B, Cin, Chid, Cout, H, W = 2, 16, 32, 2, 16, 16

    key = jax.random.PRNGKey(0)
    k1, k2, k3, k4, k5 = jax.random.split(key, 5)
    x = jax.random.normal(k1, (B, Cin, H, W), jnp.float32)
    w1 = jax.random.normal(k2, (Chid, Cin, 3, 3), jnp.float32) * 0.05
    b1 = jax.random.normal(k3, (Chid,), jnp.float32) * 0.05
    w2 = jax.random.normal(k4, (Cout, Chid, 3, 3), jnp.float32) * 0.05
    b2 = jax.random.normal(k5, (Cout,), jnp.float32) * 0.05

    ref = _reference_flow_head(x, w1, b1, w2, b2)

    # f32 compute path (tight check).
    out_f32 = flow_head_pallas(x, w1, b1, w2, b2, compute_dtype=jnp.float32)
    jax.block_until_ready(out_f32)
    assert out_f32.shape == (B, Cout, H, W)
    assert jnp.allclose(out_f32, ref, rtol=1e-3, atol=1e-3), "f32 mismatch vs reference"

    # Default bf16 compute path (v6e/v7x MXU-native), f32 accumulation.
    out_bf16 = flow_head_pallas(x, w1, b1, w2, b2)
    jax.block_until_ready(out_bf16)
    assert out_bf16.shape == (B, Cout, H, W)
    assert jnp.allclose(out_bf16, ref, rtol=5e-2, atol=2e-1), "bf16 mismatch vs reference"

    print("KERNEL_OK")
</pallas_src>

<mosaic_0001>
module attributes {stable_mosaic.version = 11 : i64} {
  func.func @kernel(%arg0: i32, %arg1: memref<1x16x256xf32, #tpu.memory_space<vmem>>, %arg2: memref<32x144xf32, #tpu.memory_space<vmem>>, %arg3: memref<32x1xf32, #tpu.memory_space<vmem>>, %arg4: memref<18x32xf32, #tpu.memory_space<vmem>>, %arg5: memref<2x1xf32, #tpu.memory_space<vmem>>, %arg6: memref<3x384xf32, #tpu.memory_space<vmem>>, %arg7: memref<1x2x256xf32, #tpu.memory_space<vmem>>, %arg8: memref<16x384xf32, #tpu.memory_space<vmem>>, %arg9: memref<144x384xf32, #tpu.memory_space<vmem>>) attributes {dimension_semantics = [#tpu.dimension_semantics<parallel>], iteration_bounds = array<i64: 2>, scalar_prefetch = 0 : i64, scratch_operands = 2 : i64, tpu.core_type = #tpu.core_type<tc>, window_params = [{transform_indices = @transform_0, window_bounds = array<i64: 1, 16, 256>}, {pipeline_mode = #tpu.pipeline_mode<synchronous>, transform_indices = @transform_1, window_bounds = array<i64: 32, 144>}, {pipeline_mode = #tpu.pipeline_mode<synchronous>, transform_indices = @transform_2, window_bounds = array<i64: 32, 1>}, {pipeline_mode = #tpu.pipeline_mode<synchronous>, transform_indices = @transform_3, window_bounds = array<i64: 18, 32>}, {pipeline_mode = #tpu.pipeline_mode<synchronous>, transform_indices = @transform_4, window_bounds = array<i64: 2, 1>}, {pipeline_mode = #tpu.pipeline_mode<synchronous>, transform_indices = @transform_5, window_bounds = array<i64: 3, 384>}, {transform_indices = @transform_6, window_bounds = array<i64: 1, 2, 256>}]} {
    %cst = arith.constant 0.000000e+00 : f32
    %0 = vector.broadcast %cst : f32 to vector<16x128xf32>
    %c0 = arith.constant 0 : index
    %c256 = arith.constant 256 : index
    %1 = vector.load %arg8[%c0, %c256] : memref<16x384xf32, #tpu.memory_space<vmem>>, vector<16x128xf32>
    tpu.vector_store %arg8[%c0, %c256], %0 {strides = array<i32>} : memref<16x384xf32, #tpu.memory_space<vmem>>, vector<16x128xf32>,
    %c0_0 = arith.constant 0 : index
    %c0_1 = arith.constant 0 : index
    %c0_2 = arith.constant 0 : index
    %2 = vector.load %arg1[%c0_0, %c0_1, %c0_2] : memref<1x16x256xf32, #tpu.memory_space<vmem>>, vector<1x16x256xf32>
    %3 = vector.shape_cast %2 : vector<1x16x256xf32> to vector<16x256xf32>
    %c0_3 = arith.constant 0 : index
    %c0_4 = arith.constant 0 : index
    %4 = vector.load %arg8[%c0_3, %c0_4] : memref<16x384xf32, #tpu.memory_space<vmem>>, vector<16x256xf32>
    tpu.vector_store %arg8[%c0_3, %c0_4], %3 {strides = array<i32>} : memref<16x384xf32, #tpu.memory_space<vmem>>, vector<16x256xf32>,
    %c0_5 = arith.constant 0 : index
    %c0_6 = arith.constant 0 : index
    %5 = vector.load %arg8[%c0_5, %c0_6] : memref<16x384xf32, #tpu.memory_space<vmem>>, vector<16x384xf32>
    %c0_7 = arith.constant 0 : index
    %c0_8 = arith.constant 0 : index
    %6 = vector.load %arg6[%c0_7, %c0_8] : memref<3x384xf32, #tpu.memory_space<vmem>>, vector<1x384xf32>
    %c1 = arith.constant 1 : index
    %c0_9 = arith.constant 0 : index
    %7 = vector.load %arg6[%c1, %c0_9] : memref<3x384xf32, #tpu.memory_space<vmem>>, vector<1x384xf32>
    %c17_i32 = arith.constant 17 : i32
    %8 = tpu.dynamic_rotate %5 by %c17_i32 dim 1 : vector<16x384xf32>, i32 -> vector<16x384xf32>
    %9 = vector.broadcast %6 : vector<1x384xf32> to vector<16x384xf32>
    %10 = arith.mulf %8, %9 : vector<16x384xf32>
    %c0_10 = arith.constant 0 : index
    %c0_11 = arith.constant 0 : index
    %11 = vector.load %arg9[%c0_10, %c0_11] : memref<144x384xf32, #tpu.memory_space<vmem>>, vector<16x384xf32>
    tpu.vector_store %arg9[%c0_10, %c0_11], %10 {strides = array<i32>} : memref<144x384xf32, #tpu.memory_space<vmem>>, vector<16x384xf32>,
    %c16_i32 = arith.constant 16 : i32
    %12 = tpu.dynamic_rotate %5 by %c16_i32 dim 1 : vector<16x384xf32>, i32 -> vector<16x384xf32>
    %c16 = arith.constant 16 : index
    %c0_12 = arith.constant 0 : index
    %13 = vector.load %arg9[%c16, %c0_12] : memref<144x384xf32, #tpu.memory_space<vmem>>, vector<16x384xf32>
    tpu.vector_store %arg9[%c16, %c0_12], %12 {strides = array<i32>} : memref<144x384xf32, #tpu.memory_space<vmem>>, vector<16x384xf32>,
    %c15_i32 = arith.constant 15 : i32
    %14 = tpu.dynamic_rotate %5 by %c15_i32 dim 1 : vector<16x384xf32>, i32 -> vector<16x384xf32>
    %15 = vector.broadcast %7 : vector<1x384xf32> to vector<16x384xf32>
    %16 = arith.mulf %14, %15 : vector<16x384xf32>
    %c32 = arith.constant 32 : index
    %c0_13 = arith.constant 0 : index
    %17 = vector.load %arg9[%c32, %c0_13] : memref<144x384xf32, #tpu.memory_space<vmem>>, vector<16x384xf32>
    tpu.vector_store %arg9[%c32, %c0_13], %16 {strides = array<i32>} : memref<144x384xf32, #tpu.memory_space<vmem>>, vector<16x384xf32>,
    %c1_i32 = arith.constant 1 : i32
    %18 = tpu.dynamic_rotate %5 by %c1_i32 dim 1 : vector<16x384xf32>, i32 -> vector<16x384xf32>
    %19 = vector.broadcast %6 : vector<1x384xf32> to vector<16x384xf32>
    %20 = arith.mulf %18, %19 : vector<16x384xf32>
    %c48 = arith.constant 48 : index
    %c0_14 = arith.constant 0 : index
    %21 = vector.load %arg9[%c48, %c0_14] : memref<144x384xf32, #tpu.memory_space<vmem>>, vector<16x384xf32>
    tpu.vector_store %arg9[%c48, %c0_14], %20 {strides = array<i32>} : memref<144x384xf32, #tpu.memory_space<vmem>>, vector<16x384xf32>,
    %c64 = arith.constant 64 : index
    %c0_15 = arith.constant 0 : index
    %22 = vector.load %arg9[%c64, %c0_15] : memref<144x384xf32, #tpu.memory_space<vmem>>, vector<16x384xf32>
    tpu.vector_store %arg9[%c64, %c0_15], %5 {strides = array<i32>} : memref<144x384xf32, #tpu.memory_space<vmem>>, vector<16x384xf32>,
    %c383_i32 = arith.constant 383 : i32
    %23 = tpu.dynamic_rotate %5 by %c383_i32 dim 1 : vector<16x384xf32>, i32 -> vector<16x384xf32>
    %24 = vector.broadcast %7 : vector<1x384xf32> to vector<16x384xf32>
    %25 = arith.mulf %23, %24 : vector<16x384xf32>
    %c80 = arith.constant 80 : index
    %c0_16 = arith.constant 0 : index
    %26 = vector.load %arg9[%c80, %c0_16] : memref<144x384xf32, #tpu.memory_space<vmem>>, vector<16x384xf32>
    tpu.vector_store %arg9[%c80, %c0_16], %25 {strides = array<i32>} : memref<144x384xf32, #tpu.memory_space<vmem>>, vector<16x384xf32>,
    %c369_i32 = arith.constant 369 : i32
    %27 = tpu.dynamic_rotate %5 by %c369_i32 dim 1 : vector<16x384xf32>, i32 -> vector<16x384xf32>
    %28 = vector.broadcast %6 : vector<1x384xf32> to vector<16x384xf32>
    %29 = arith.mulf %27, %28 : vector<16x384xf32>
    %c96 = arith.constant 96 : index
    %c0_17 = arith.constant 0 : index
    %30 = vector.load %arg9[%c96, %c0_17] : memref<144x384xf32, #tpu.memory_space<vmem>>, vector<16x384xf32>
    tpu.vector_store %arg9[%c96, %c0_17], %29 {strides = array<i32>} : memref<144x384xf32, #tpu.memory_space<vmem>>, vector<16x384xf32>,
    %c368_i32 = arith.constant 368 : i32
    %31 = tpu.dynamic_rotate %5 by %c368_i32 dim 1 : vector<16x384xf32>, i32 -> vector<16x384xf32>
    %c112 = arith.constant 112 : index
    %c0_18 = arith.constant 0 : index
    %32 = vector.load %arg9[%c112, %c0_18] : memref<144x384xf32, #tpu.memory_space<vmem>>, vector<16x384xf32>
    tpu.vector_store %arg9[%c112, %c0_18], %31 {strides = array<i32>} : memref<144x384xf32, #tpu.memory_space<vmem>>, vector<16x384xf32>,
    %c367_i32 = arith.constant 367 : i32
    %33 = tpu.dynamic_rotate %5 by %c367_i32 dim 1 : vector<16x384xf32>, i32 -> vector<16x384xf32>
    %34 = vector.broadcast %7 : vector<1x384xf32> to vector<16x384xf32>
    %35 = arith.mulf %33, %34 : vector<16x384xf32>
    %c128 = arith.constant 128 : index
    %c0_19 = arith.constant 0 : index
    %36 = vector.load %arg9[%c128, %c0_19] : memref<144x384xf32, #tpu.memory_space<vmem>>, vector<16x384xf32>
    tpu.vector_store %arg9[%c128, %c0_19], %35 {strides = array<i32>} : memref<144x384xf32, #tpu.memory_space<vmem>>, vector<16x384xf32>,
    %c0_20 = arith.constant 0 : index
    %c0_21 = arith.constant 0 : index
    %37 = vector.load %arg2[%c0_20, %c0_21] : memref<32x144xf32, #tpu.memory_space<vmem>>, vector<32x144xf32>
    %c0_22 = arith.constant 0 : index
    %c0_23 = arith.constant 0 : index
    %38 = vector.load %arg9[%c0_22, %c0_23] : memref<144x384xf32, #tpu.memory_space<vmem>>, vector<144x384xf32>
    %cst_24 = arith.constant dense<0.000000e+00> : vector<32x384xf32>
    %39 = tpu.matmul %37, %38, %cst_24 {dimension_numbers = #tpu.dot_dimension_numbers<[1], [0], [0], [1], [0, 0, 1, 1], [], []>} : vector<32x144xf32>, vector<144x384xf32>, vector<32x384xf32> -> vector<32x384xf32>
    %c0_25 = arith.constant 0 : index
    %c0_26 = arith.constant 0 : index
    %40 = vector.load %arg3[%c0_25, %c0_26] : memref<32x1xf32, #tpu.memory_space<vmem>>, vector<32x1xf32>
    %41 = vector.broadcast %40 : vector<32x1xf32> to vector<32x384xf32>
    %42 = arith.addf %39, %41 : vector<32x384xf32>
    %cst_27 = arith.constant 0.000000e+00 : f32
    %43 = vector.broadcast %cst_27 : f32 to vector<32x384xf32>
    %44 = arith.maximumf %42, %43 : vector<32x384xf32>
    %c2 = arith.constant 2 : index
    %c0_28 = arith.constant 0 : index
    %45 = vector.load %arg6[%c2, %c0_28] : memref<3x384xf32, #tpu.memory_space<vmem>>, vector<1x384xf32>
    %46 = vector.broadcast %45 : vector<1x384xf32> to vector<32x384xf32>
    %47 = arith.mulf %44, %46 : vector<32x384xf32>
    %c0_29 = arith.constant 0 : index
    %c0_30 = arith.constant 0 : index
    %48 = vector.load %arg4[%c0_29, %c0_30] : memref<18x32xf32, #tpu.memory_space<vmem>>, vector<18x32xf32>
    %cst_31 = arith.constant dense<0.000000e+00> : vector<18x384xf32>
    %49 = tpu.matmul %48, %47, %cst_31 {dimension_numbers = #tpu.dot_dimension_numbers<[1], [0], [0], [1], [0, 0, 1, 1], [], []>} : vector<18x32xf32>, vector<32x384xf32>, vector<18x384xf32> -> vector<18x384xf32>
    %cst_32 = arith.constant 0.000000e+00 : f32
    %50 = vector.broadcast %cst_32 : f32 to vector<2x384xf32>
    %51 = vector.extract_strided_slice %49 {offsets = [0, 0], sizes = [2, 384], strides = [1, 1]} : vector<18x384xf32> to vector<2x384xf32>
    %c17_i32_33 = arith.constant 17 : i32
    %52 = tpu.dynamic_rotate %51 by %c17_i32_33 dim 1 : vector<2x384xf32>, i32 -> vector<2x384xf32>
    %53 = vector.broadcast %6 : vector<1x384xf32> to vector<2x384xf32>
    %54 = arith.mulf %52, %53 : vector<2x384xf32>
    %55 = arith.addf %50, %54 : vector<2x384xf32>
    %56 = vector.extract_strided_slice %49 {offsets = [2, 0], sizes = [2, 384], strides = [1, 1]} : vector<18x384xf32> to vector<2x384xf32>
    %c16_i32_34 = arith.constant 16 : i32
    %57 = tpu.dynamic_rotate %56 by %c16_i32_34 dim 1 : vector<2x384xf32>, i32 -> vector<2x384xf32>
    %58 = arith.addf %55, %57 : vector<2x384xf32>
    %59 = vector.extract_strided_slice %49 {offsets = [4, 0], sizes = [2, 384], strides = [1, 1]} : vector<18x384xf32> to vector<2x384xf32>
    %c15_i32_35 = arith.constant 15 : i32
    %60 = tpu.dynamic_rotate %59 by %c15_i32_35 dim 1 : vector<2x384xf32>, i32 -> vector<2x384xf32>
    %61 = vector.broadcast %7 : vector<1x384xf32> to vector<2x384xf32>
    %62 = arith.mulf %60, %61 : vector<2x384xf32>
    %63 = arith.addf %58, %62 : vector<2x384xf32>
    %64 = vector.extract_strided_slice %49 {offsets = [6, 0], sizes = [2, 384], strides = [1, 1]} : vector<18x384xf32> to vector<2x384xf32>
    %c1_i32_36 = arith.constant 1 : i32
    %65 = tpu.dynamic_rotate %64 by %c1_i32_36 dim 1 : vector<2x384xf32>, i32 -> vector<2x384xf32>
    %66 = vector.broadcast %6 : vector<1x384xf32> to vector<2x384xf32>
    %67 = arith.mulf %65, %66 : vector<2x384xf32>
    %68 = arith.addf %63, %67 : vector<2x384xf32>
    %69 = vector.extract_strided_slice %49 {offsets = [8, 0], sizes = [2, 384], strides = [1, 1]} : vector<18x384xf32> to vector<2x384xf32>
    %70 = arith.addf %68, %69 : vector<2x384xf32>
    %71 = vector.extract_strided_slice %49 {offsets = [10, 0], sizes = [2, 384], strides = [1, 1]} : vector<18x384xf32> to vector<2x384xf32>
    %c383_i32_37 = arith.constant 383 : i32
    %72 = tpu.dynamic_rotate %71 by %c383_i32_37 dim 1 : vector<2x384xf32>, i32 -> vector<2x384xf32>
    %73 = vector.broadcast %7 : vector<1x384xf32> to vector<2x384xf32>
    %74 = arith.mulf %72, %73 : vector<2x384xf32>
    %75 = arith.addf %70, %74 : vector<2x384xf32>
    %76 = vector.extract_strided_slice %49 {offsets = [12, 0], sizes = [2, 384], strides = [1, 1]} : vector<18x384xf32> to vector<2x384xf32>
    %c369_i32_38 = arith.constant 369 : i32
    %77 = tpu.dynamic_rotate %76 by %c369_i32_38 dim 1 : vector<2x384xf32>, i32 -> vector<2x384xf32>
    %78 = vector.broadcast %6 : vector<1x384xf32> to vector<2x384xf32>
    %79 = arith.mulf %77, %78 : vector<2x384xf32>
    %80 = arith.addf %75, %79 : vector<2x384xf32>
    %81 = vector.extract_strided_slice %49 {offsets = [14, 0], sizes = [2, 384], strides = [1, 1]} : vector<18x384xf32> to vector<2x384xf32>
    %c368_i32_39 = arith.constant 368 : i32
    %82 = tpu.dynamic_rotate %81 by %c368_i32_39 dim 1 : vector<2x384xf32>, i32 -> vector<2x384xf32>
    %83 = arith.addf %80, %82 : vector<2x384xf32>
    %84 = vector.extract_strided_slice %49 {offsets = [16, 0], sizes = [2, 384], strides = [1, 1]} : vector<18x384xf32> to vector<2x384xf32>
    %c367_i32_40 = arith.constant 367 : i32
    %85 = tpu.dynamic_rotate %84 by %c367_i32_40 dim 1 : vector<2x384xf32>, i32 -> vector<2x384xf32>
    %86 = vector.broadcast %7 : vector<1x384xf32> to vector<2x384xf32>
    %87 = arith.mulf %85, %86 : vector<2x384xf32>
    %88 = arith.addf %83, %87 : vector<2x384xf32>
    %89 = vector.extract_strided_slice %88 {offsets = [0, 0], sizes = [2, 256], strides = [1, 1]} : vector<2x384xf32> to vector<2x256xf32>
    %c0_41 = arith.constant 0 : index
    %c0_42 = arith.constant 0 : index
    %90 = vector.load %arg5[%c0_41, %c0_42] : memref<2x1xf32, #tpu.memory_space<vmem>>, vector<2x1xf32>
    %91 = vector.broadcast %90 : vector<2x1xf32> to vector<2x256xf32>
    %92 = arith.addf %89, %91 : vector<2x256xf32>
    %c0_43 = arith.constant 0 : index
    %c0_44 = arith.constant 0 : index
    %c0_45 = arith.constant 0 : index
    %93 = vector.load %arg7[%c0_43, %c0_44, %c0_45] : memref<1x2x256xf32, #tpu.memory_space<vmem>>, vector<1x2x256xf32>
    %94 = vector.shape_cast %93 : vector<1x2x256xf32> to vector<2x256xf32>
    %95 = vector.shape_cast %92 : vector<2x256xf32> to vector<1x2x256xf32>
    tpu.vector_store %arg7[%c0_43, %c0_44, %c0_45], %95 {strides = array<i32>} : memref<1x2x256xf32, #tpu.memory_space<vmem>>, vector<1x2x256xf32>,
    return
  }
  func.func @transform_0(%arg0: i32) -> (i32, i32, i32) {
    %c0_i32 = arith.constant 0 : i32
    %c0_i32_0 = arith.constant 0 : i32
    %c0_i32_1 = arith.constant 0 : i32
    return %arg0, %c0_i32, %c0_i32_0 : i32, i32, i32
  }
  func.func @transform_1(%arg0: i32) -> (i32, i32) {
    %c0_i32 = arith.constant 0 : i32
    %c0_i32_0 = arith.constant 0 : i32
    %c0_i32_1 = arith.constant 0 : i32
    return %c0_i32, %c0_i32_0 : i32, i32
  }
  func.func @transform_2(%arg0: i32) -> (i32, i32) {
    %c0_i32 = arith.constant 0 : i32
    %c0_i32_0 = arith.constant 0 : i32
    %c0_i32_1 = arith.constant 0 : i32
    return %c0_i32, %c0_i32_0 : i32, i32
  }
  func.func @transform_3(%arg0: i32) -> (i32, i32) {
    %c0_i32 = arith.constant 0 : i32
    %c0_i32_0 = arith.constant 0 : i32
    %c0_i32_1 = arith.constant 0 : i32
    return %c0_i32, %c0_i32_0 : i32, i32
  }
  func.func @transform_4(%arg0: i32) -> (i32, i32) {
    %c0_i32 = arith.constant 0 : i32
    %c0_i32_0 = arith.constant 0 : i32
    %c0_i32_1 = arith.constant 0 : i32
    return %c0_i32, %c0_i32_0 : i32, i32
  }
  func.func @transform_5(%arg0: i32) -> (i32, i32) {
    %c0_i32 = arith.constant 0 : i32
    %c0_i32_0 = arith.constant 0 : i32
    %c0_i32_1 = arith.constant 0 : i32
    return %c0_i32, %c0_i32_0 : i32, i32
  }
  func.func @transform_6(%arg0: i32) -> (i32, i32, i32) {
    %c0_i32 = arith.constant 0 : i32
    %c0_i32_0 = arith.constant 0 : i32
    %c0_i32_1 = arith.constant 0 : i32
    return %arg0, %c0_i32, %c0_i32_0 : i32, i32, i32
  }
}

</mosaic_0001>

<bundles_post_ra>
// kernel: tpu_custom_call.1
= control target key start
LH: loop header
LB: loop body
LE: loop exit
PB: predicated region body
PF: predicated region fallthrough
CT: control target
= control target key end

     0   :  { %11 = vsyncpa [#allocation5], 0  ;;  %s2380_s0 = inlined_call_operand.hbm [shape: f32[2,16,256], index: 0, kind: input, shape index: {}]   ;;  %s2381_s1 = inlined_call_operand.hbm [shape: f32[32,144], index: 1, kind: input, shape index: {}]   ;;  %s2382_s2 = inlined_call_operand.vmem [shape: f32[32,1], index: 2, kind: input, shape index: {}]   ;;  %s2383_s3 = inlined_call_operand.vmem [shape: f32[18,32], index: 3, kind: input, shape index: {}]   ;;  %s2384_s4 = inlined_call_operand.vmem [shape: f32[2,1], index: 4, kind: input, shape index: {}]   ;;  %s2385_s5 = inlined_call_operand.vmem [shape: f32[3,384], index: 5, kind: input, shape index: {}]   ;;  %s2386_s6 = inlined_call_operand.hbm [shape: f32[2,2,256], index: 6, kind: output, shape index: {}]  }
   0x1   :  { %13 = vsyncpa [#allocation5 + $0x1], 0 }
   0x2   :  { %14 = vsyncpa [#allocation8], 0 }
   0x3   :  { %15 = vsyncpa [#allocation6], 0 }
   0x4   :  { %17 = vsyncpa [#allocation6 + $0x1], 0  ;;  %s1772_s21 = smov 0   ;;  %s1774_s22 = smov 0  }
   0x5   :  { %s1776_s23 = smov 0   ;;  %s1778_s24 = smov 0  }
   0x6 LB: > { %s1793_s25 = sadd.s32 4294967295, %s1718_s24   ;;  %s1322_s26 = sadd.s32 4294967294, %s1718_s24   ;;  %s1718_s24 = sphi %s1778_s24, %s2412_s24   ;;  %s1714_s23 = sphi %s1776_s23, %s2411_s23   ;;  %s1710_s22 = sphi %s1774_s22, %s2410_s22   ;;  %s1706_s21 = sphi %s1772_s21, %s2409_s21  }
   0x7   : > { %p43_p0 = scmp.ne.s32.totalorder %s1710_s22, %s1706_s21  ;;  %p2387_p1 = scmp.eq.s32.totalorder %s1793_s25, 0 }
   0x8   : > { %p178_p3 = scmp.eq.s32.totalorder %s1322_s26, 1  ;;  %p1323_p5 = scmp.ge.s32.totalorder %s1718_s24, 1 }
   0x9   : > { %p1802_p4 = por %p2387_p1, %p43_p0  ;;  %p185_p7 = scmp.lt.s32.totalorder %s1718_s24, 3 }
   0xa   : > { %p1807_p6 = por %p178_p3, %p43_p0  ;;  %s1720_s30 = smov [#allocation7]  }
   0xb   : > { %s2394_s27 = scalar_select %p1802_p4, 1, 0 }
   0xc   : > { %s2395_s28 = scalar_select %p1807_p6, 1, 0 }
   0xd   : > { %p1812_p8 = pnand %p1323_p5, %p185_p7  ;;  %s197_s7 = sshll.u32 %s1720_s30, 4  ;;  %s1816_s7 = int_to_ptr.vmem [resolvable:$true] %s197_s7 }
   0xe   : > { %s1828_s9 = sadd.s32 1, %s1718_s24   ;;  %s30_s10 = sadd.s32 1, %s1714_s23 }
   0xf   : > { %s2396_s29 = scalar_select %p1812_p8, 1, 0 }
  0x10   : > { %p1465_p9 = pneg %p1812_p8  ;;  %s27_s11 = ssub.s32 %s1718_s24, %s1828_s9 }
  0x11   : > { %s1590_s14 = scalar_lea.hbm %s2381_s1, 1024 }
  0x12   : > { %p1823_p11 = pnand %p1465_p9, %p2387_p1  ;;  %p1591_p12 = scmp.ne.s32.totalorder %s2381_s1, %s1590_s14 }
  0x13   : > { %p1597_p5 = scmp.lt.u32.totalorder %s1590_s14, %s2381_s1 }
  0x14   : > { %p1592_p13 = pneg %p1823_p11 }
  0x16   : > { %p1593_p0 = pnand %p1592_p13, %p1591_p12 }
  0x18   : > { %p1594_p3 = pneg %p1593_p0 }
  0x1a   : > { %p1599_p7 = pnand %p1597_p5, %p1594_p3 }
  0x1c   : > { %1602 = shalt.err (!%p1599_p7)
}
  0x1d   : > { %s1603_s19 = scalar_lea.vmem %s1816_s7, 1024  ;;  %p1611_p2 = scmp.lt.s32.totalorder %s1816_s7, %s1816_s7 }
  0x1e   : > { %p1604_p9 = scmp.ne.s32.totalorder %s1816_s7, %s1603_s19  ;;  %p1612_p6 = scmp.lt.s32.totalorder %s1603_s19, %s1603_s19 }
  0x20   : > { %p1606_p10 = pnand %p1604_p9, %p1592_p13  ;;  %p1613_p4 = por %p1612_p6, %p1611_p2 }
  0x22   : > { %p1607_p1 = pneg %p1606_p10 }
  0x24   : > { %p1614_p8 = pnand %p1613_p4, %p1607_p1 }
  0x26   : > { %1617 = shalt.err (!%p1614_p8)
}
  0x27   : > { %s1721_s20 = smov 256   ;;  %s1722_s26 = smov 16  }
  0x28   : > { %1468 = dma.hbm_to_vmem [thread:$0]  (!%p1823_p11), %s2381_s1, 1024, %s1816_s7, [#allocation8], %s1721_s20, %s1721_s20, %s1722_s26  }
  0x29   : > { %p28_p1 = scmp.eq.s32.totalorder %s27_s11, 0  ;;  %p37_p2 = scmp.ne.s32.totalorder %s1714_s23, %s1710_s22 }
  0x2a   : > { %p38_p4 = scmp.eq.s32.totalorder %s1718_s24, 0  ;;  %p1478_p6 = scmp.lt.s32.totalorder %s1718_s24, 2 }
  0x2b   : > { %s1862_s13 = scalar_select %p28_p1, %s1714_s23, %s30_s10  }
  0x2c   : > { %p39_p8 = por %p38_p4, %p37_p2  ;;  %p2398_p10 = scmp.eq.s32.totalorder %s1793_s25, 1 }
  0x2d   : > { %s223_s8 = sand.u32 1, %s1714_s23   ;;  %s1355_s15 = sshll.u32 %s1718_s24, 9 }
  0x2e   : > { %p1866_p12 = por %p2398_p10, %p37_p2  ;;  %s1326_s16 = sshll.u32 %s223_s8, 5 }
  0x2f   : > { %s1875_s19 = scalar_lea.hbm %s2380_s0, %s1355_s15  ;;  %s227_s7 = scalar_lea.vmem [#allocation4], %s1326_s16 }
  0x30   : > { %s234_s10 = sshll.u32 %s227_s7, 4  ;;  %p1877_p11 = pnand %p1478_p6, %p39_p8  ;;  %s1881_s10 = int_to_ptr.vmem [resolvable:$true] %s234_s10 }
  0x31   : > { %s1883_s30 = scalar_lea.sflag [#allocation5], %s223_s8  ;;  %s1618_s12 = scalar_lea.hbm %s1875_s19, 512 }
  0x32   : > { %p1619_p13 = scmp.ne.s32.totalorder %s1875_s19, %s1618_s12  ;;  %p1620_p0 = pneg %p1877_p11 }
  0x33   : > { %s1623_s17 = scalar_lea.hbm %s2380_s0, 1024  ;;  %p1624_p7 = scmp.lt.u32.totalorder %s1875_s19, %s2380_s0 }
  0x34   : > { %p1621_p3 = pnand %p1620_p0, %p1619_p13  ;;  %p1625_p9 = scmp.lt.u32.totalorder %s1623_s17, %s1618_s12 }
  0x35   : > { %p1627_p2 = scmp.lt.u32.totalorder %s1618_s12, %s1875_s19 }
  0x36   : > { %p1622_p5 = pneg %p1621_p3  ;;  %p1626_p1 = por %p1625_p9, %p1624_p7 }
  0x38   : > { %p1628_p4 = por %p1627_p2, %p1626_p1 }
  0x3a   : > { %p1629_p6 = pnand %p1628_p4, %p1622_p5 }
  0x3c   : > { %1632 = shalt.err (!%p1629_p6)
}
  0x3d   : > { %s1633_s8 = scalar_lea.vmem %s1881_s10, 512  ;;  %s1723_s15 = smov [#allocation4]  }
  0x3e   : > { %p1634_p8 = scmp.ne.s32.totalorder %s1881_s10, %s1633_s8  ;;  %s1638_s16 = sshll.u32 %s1723_s15, 4  ;;  %s1639_s16 = int_to_ptr.vmem [resolvable:$false] %s1638_s16 }
  0x3f   : > { %s1640_s18 = scalar_lea.vmem %s1639_s16, 1024  ;;  %p1641_p3 = scmp.lt.s32.totalorder %s1881_s10, %s1639_s16 }
  0x40   : > { %p1636_p10 = pnand %p1634_p8, %p1620_p0  ;;  %p1642_p7 = scmp.lt.s32.totalorder %s1640_s18, %s1633_s8 }
  0x42   : > { %p1637_p13 = pneg %p1636_p10  ;;  %p1643_p9 = por %p1642_p7, %p1641_p3 }
  0x44   : > { %p1644_p1 = pnand %p1643_p9, %p1637_p13 }
  0x46   : > { %1647 = shalt.err (!%p1644_p1)
}
  0x47   : > { %1472 = dma.hbm_to_vmem [thread:$0]  (!%p1877_p11), %s1875_s19, 512, %s1881_s10, %s1883_s30, %s1721_s20, %s1721_s20, %s1722_s26  }
  0x48   : > { %p2401_p0 = scmp.ne.s32.totalorder %s2396_s29, 0 }
  0x49   : > { %s1917_s12 = sand.u32 (!%p2401_p0), 1, %s1710_s22   ;;  %p2402_p5 = scmp.ne.s32.totalorder (!%p2401_p0), %s2394_s27, 0 }
  0x4a   : > { %246 = sbr.rel (%p2401_p0) target bundleno = 909 (0x38d), region = 44  ;;  %s1330_s17 = sshll.u32 (!%p2401_p0), %s1917_s12, 5 }
  0x4b   : > { %s249_s7 = scalar_lea.sflag (!%p2401_p0), [#allocation5], %s1917_s12  ;;  %s252_s8 = scalar_lea.vmem (!%p2401_p0), [#allocation4], %s1330_s17 }
  0x51   : > { %1693 = dma.done.wait (%p2402_p5), %s249_s7, 512  }
  0x52   : > { %1695 = vsyncadd (%p2402_p5), %s249_s7, 4294966784  ;;  %p2403_p2 = scmp.eq.s32.totalorder %s1793_s25, 0 }
  0x54   : > { %1697 = dma.done.wait (%p2403_p2), [#allocation8], 1024   ;;  %p2404_p11 = pmov %p2403_p2 }
  0x55   : > { %v1724_v0 = vmov 0.0   ;;  %s1725_s29 = smov 17   ;;  %v1726_v1 = vmov 0.0|0.0   ;;  %v1932_v2 = vld [vmem:[%s252_s8 + $0x8] sm:$0xff]  ;;  %v1934_v3 = vld [vmem:[%s252_s8] sm:$0xff]  ;;  %v1940_v4 = vld [vmem:[%s252_s8 + $0x18] sm:$0xff]  ;;  %v316_v16 = vlaneseq }
  0x56   : > { %1699 = vsyncadd (%p2404_p11), [#allocation8], 4294966272  ;;  %1529 = vrot.lane.b32.xlu0 %v1724_v0, %s1725_s29  ;;  %1417 = vmatprep.subr.bf16.mxu1 %v1726_v1  ;;  %v1942_v5 = vld [vmem:[%s252_s8 + $0x10] sm:$0xff]  ;;  %v1538_v7 = vpack.i.bf16 %v1940_v4, %v1932_v2  ;;  %s1727_s27 = smov 16   ;;  %s1728_s20 = smov 15   ;;  %v1397_v8 = vpack.c.bf16 %v1940_v4, %v1932_v2  ;;  %v581_v9 = vld [vmem:[#allocation7 + $0x8] sm:$0xff] }
  0x57   : > { %308 = vrot.lane.b32.xlu1 %v1932_v2, %s1725_s29  ;;  %v1533_v6 = vpack.i.bf16 %v1942_v5, %v1934_v3  ;;  %s1729_s26 = smov 1   ;;  %s1730_s19 = smov 127   ;;  %vm666_vm0 = vcmask 130048   ;;  %v643_v10 = vld [vmem:[%s2382_s2 + $0x8] sm:$0xff]  ;;  %v642_v11 = vld [vmem:[%s2382_s2] sm:$0xff]  ;;  %v1734_v12 = vmov 0  }
  0x58   : > { %s2392_s10 = smov 113   ;;  %s2390_s11 = smov 112   ;;  %1334 = vmatprep.mubr.msk.f32.mxu0 %vm666_vm0, %v581_v9  ;;  %1338 = vmatprep.mubr.msk.f32.mxu1 %vm666_vm0, %v581_v9  ;;  %v644_v13 = vld [vmem:[%s2382_s2 + $0x10] sm:$0xff]  ;;  %v645_v14 = vld [vmem:[%s2382_s2 + $0x18] sm:$0xff]  ;;  %v1207_v15 = vld [vmem:[%s2384_s4] sm:$0x3] }
  0x59   : > { %s1733_s30 = smov 111   ;;  %1589 = vset.pattern.permute.xlu1 %v1734_v12  ;;  %1588 = vset.pattern.permute.xlu0 %v1734_v12  ;;  %v327_v17 = vshrl.u32 %v316_v16, 7  ;;  %v2029_v18 = vand.u32 127, %v316_v16  ;;  %v301_v22 = vld [vmem:[%s2385_s5] ss:$4 sm:$0x7] }
  0x5a   : > { %304 = vrot.lane.b32.xlu0 %v1934_v3, %s1725_s29  ;;  %v1333_v61 = vld [vmem:[%s2385_s5 + $0x1] ss:$4 sm:$0x7]  ;;  %vm1735_vm9 = vmmov 0   ;;  %vm898_vm10 = vcmask 261120   ;;  %s1228_s16 = scalar_lea.sflag [#allocation6], %s1917_s12 }
  0x5b   : > { %310 = vrot.lane.b32.xlu1 %v1940_v4, %s1725_s29  ;;  %v2031_v20 = vsub.s32 2, %v327_v17  ;;  %v2036_v23 = vsub.s32 0, %v327_v17  ;;  %vm318_vm1 = vcmp.lt.s32.totalorder %v2029_v18, 17  ;;  %v2039_v24 = vsub.s32 1, %v327_v17  ;;  %s1736_s18 = smov [#allocation9]  }
  0x5c   : > { %vm365_vm2 = vcmp.lt.s32.totalorder %v2029_v18, 16  ;;  %vm390_vm3 = vcmp.lt.s32.totalorder %v2029_v18, 15  ;;  %vm437_vm4 = vcmp.lt.s32.totalorder %v2029_v18, 1  ;;  %vm474_vm5 = vcmp.lt.s32.totalorder %v2029_v18, 127  ;;  %s1652_s17 = sshll.u32 %s1736_s18, 4  ;;  %s1653_s17 = int_to_ptr.vmem [resolvable:$false] %s1652_s17 }
  0x5d   : > { %v2042_v25 = vrot.slane %v301_v22, %v2031_v20  ;;  %v2045_v28 = vrot.slane %v301_v22, %v2036_v23  ;;  %v2050_v30 = vrot.slane %v301_v22, %v2039_v24  ;;  %vm505_vm6 = vcmp.lt.s32.totalorder %v2029_v18, 113 }
  0x5e   : > { %306 = vrot.lane.b32.xlu0 %v1942_v5, %s1725_s29  ;;  %vm536_vm7 = vcmp.lt.s32.totalorder %v2029_v18, 112  ;;  %vm561_vm8 = vcmp.lt.s32.totalorder %v2029_v18, 111 }
  0x5f   : > { %1534 = vrot.lane.b32.xlu1 %v1533_v6, %s1727_s27 }
  0x62   : > { %1539 = vrot.lane.b32.xlu0 %v1538_v7, %s1727_s27 }
  0x63   : > { %1544 = vrot.lane.b32.xlu1 %v1724_v0, %s1727_s27 }
  0x66   : > { %378 = vrot.lane.b32.xlu0 %v1934_v3, %s1728_s20 }
  0x67   : > { %380 = vrot.lane.b32.xlu1 %v1942_v5, %s1728_s20 }
  0x6a   : > { %382 = vrot.lane.b32.xlu0 %v1932_v2, %s1728_s20 }
  0x6b   : > { %384 = vrot.lane.b32.xlu1 %v1940_v4, %s1728_s20 }
  0x6e   : > { %1549 = vrot.lane.b32.xlu0 %v1724_v0, %s1728_s20 }
  0x6f   : > { %425 = vrot.lane.b32.xlu1 %v1934_v3, %s1729_s26 }
  0x72   : > { %427 = vrot.lane.b32.xlu0 %v1942_v5, %s1729_s26 }
  0x73   : > { %429 = vrot.lane.b32.xlu1 %v1932_v2, %s1729_s26 }
  0x76   : > { %431 = vrot.lane.b32.xlu0 %v1940_v4, %s1729_s26 }
  0x77   : > { %1554 = vrot.lane.b32.xlu1 %v1724_v0, %s1729_s26 }
  0x7a   : > { %466 = vrot.lane.b32.xlu0 %v1932_v2, %s1730_s19 }
  0x7b   : > { %468 = vrot.lane.b32.xlu1 %v1940_v4, %s1730_s19 }
  0x7e   : > { %1559 = vrot.lane.b32.xlu0 %v1724_v0, %s1730_s19 }
  0x7f   : > { %462 = vrot.lane.b32.xlu1 %v1934_v3, %s1730_s19 }
  0x82   : > { %464 = vrot.lane.b32.xlu0 %v1942_v5, %s1730_s19 }
  0x83   : > { %497 = vrot.lane.b32.xlu1 %v1932_v2, %s2392_s10 }
  0x86   : > { %499 = vrot.lane.b32.xlu0 %v1940_v4, %s2392_s10 }
  0x87   : > { %1564 = vrot.lane.b32.xlu1 %v1724_v0, %s2392_s10 }
  0x8a   : > { %493 = vrot.lane.b32.xlu0 %v1934_v3, %s2392_s10 }
  0x8b   : > { %495 = vrot.lane.b32.xlu1 %v1942_v5, %s2392_s10  ;;  %s1654_s10 = scalar_lea.vmem %s1653_s17, 128 }
  0x8e   : > { %1569 = vrot.lane.b32.xlu0 %v1538_v7, %s2390_s11 }
  0x8f   : > { %1574 = vrot.lane.b32.xlu1 %v1724_v0, %s2390_s11 }
  0x92   : > { %1579 = vrot.lane.b32.xlu0 %v1533_v6, %s2390_s11 }
  0x93   : > { %553 = vrot.lane.b32.xlu1 %v1932_v2, %s1733_s30 }
  0x96   : > { %555 = vrot.lane.b32.xlu0 %v1940_v4, %s1733_s30 }
  0x97   : > { %1584 = vrot.lane.b32.xlu1 %v1724_v0, %s1733_s30 }
  0x9a   : > { %549 = vrot.lane.b32.xlu0 %v1934_v3, %s1733_s30 }
  0x9b   : > { %551 = vrot.lane.b32.xlu1 %v1942_v5, %s1733_s30 }
  0x9e   : > { %648 = vperm.xlu0 %1588, %v642_v11  }
  0x9f   : > { %653 = vperm.xlu1 %1589, %v643_v10  }
  0xa2   : > { %663 = vperm.xlu0 %1588, %v645_v14  }
  0xa3   : > { %658 = vperm.xlu1 %1589, %v644_v13   ;;  %v2087_v13 = vrot.slane %v1333_v61, %v2039_v24 }
  0xa7   : > { %1210 = vperm.xlu1 %1589, %v1207_v15   ;;  %v2093_v15 = vrot.slane %v1333_v61, %v2036_v23 }
  0xc8   : > { %v1530_v19 = vpop.permute.xlu0 %1529 }
  0xc9   : > { %v1531_v21 = vunpack.i.l.bf16 %v1530_v19  ;;  %v309_v26 = vpop.permute.xlu1 %308  ;;  %v1532_v32 = vunpack.i.h.bf16 %v1530_v19  ;;  %v2096_v19 = vrot.slane %v1333_v61, %v2031_v20 }
  0xcb   : > { %v319_v29 = vsel %vm318_vm1, %v309_v26, %v1531_v21 }
  0xcc   : > { %v305_v27 = vpop.permute.xlu0 %304  ;;  %v343_v34 = vmul.f32 %v2042_v25, %v319_v29 }
  0xcd   : > { %v323_v31 = vsel %vm318_vm1, %v1531_v21, %v305_v27  ;;  %v321_v33 = vsel %vm318_vm1, %v305_v27, %v309_v26  ;;  %v311_v35 = vpop.permute.xlu1 %310 }
  0xce   : > { %v341_v37 = vmul.f32 %v2045_v28, %v323_v31  ;;  %v320_v38 = vsel %vm318_vm1, %v311_v35, %v1532_v32  ;;  %v342_v43 = vmul.f32 %v2050_v30, %v321_v33 }
  0xcf   : > { %v346_v41 = vmul.f32 %v2042_v25, %v320_v38 }
  0xd0   : > { %v307_v36 = vpop.permute.xlu0 %306 }
  0xd1   : > { %v322_v39 = vsel %vm318_vm1, %v307_v36, %v311_v35  ;;  %v324_v40 = vsel %vm318_vm1, %v1532_v32, %v307_v36  ;;  %v1535_v45 = vpop.permute.xlu1 %1534  ;;  %v1418_v48 = vpack.c.bf16 %v346_v41, %v343_v34 }
  0xd2   : > { %v344_v42 = vmul.f32 %v2045_v28, %v324_v40  ;;  %v345_v44 = vmul.f32 %v2050_v30, %v322_v39  ;;  %v1537_v50 = vunpack.i.h.bf16 %v1535_v45  ;;  %v1536_v51 = vunpack.i.l.bf16 %v1535_v45 }
  0xd3   : > { %1419 = vmatpush1.bf16.msra.mxu1 %v1418_v48 }
  0xd4   : > { %v1540_v46 = vpop.permute.xlu0 %1539  ;;  %v1381_v47 = vpack.c.bf16 %v345_v44, %v342_v43  ;;  %v1383_v49 = vpack.c.bf16 %v344_v42, %v341_v37  ;;  %1420 = vmatprep.subr.bf16.mxu1 %v1726_v1 }
  0xd5   : > { %v1542_v52 = vunpack.i.h.bf16 %v1540_v46  ;;  %v1541_v53 = vunpack.i.l.bf16 %v1540_v46  ;;  %v1545_v56 = vpop.permute.xlu1 %1544 }
  0xd6   : > { %1382 = vmatprep.subr.bf16.mxu0 %v1381_v47  ;;  %v1547_v59 = vunpack.i.h.bf16 %v1545_v56  ;;  %v1546_v60 = vunpack.i.l.bf16 %v1545_v56 }
  0xd7   : > { %1384 = vmatpush1.bf16.msra.mxu0 %v1383_v49  ;;  %v368_v54 = vsel %vm365_vm2, %v1536_v51, %v1541_v53  ;;  %v369_v55 = vsel %vm365_vm2, %v1537_v50, %v1542_v52 }
  0xd8   : > { %v379_v57 = vpop.permute.xlu0 %378  ;;  %v1385_v58 = vpack.c.bf16 %v369_v55, %v368_v54  ;;  %v370_v62 = vsel %vm365_vm2, %v1546_v60, %v1536_v51  ;;  %v371_v63 = vsel %vm365_vm2, %v1547_v59, %v1537_v50  ;;  %v366_v6 = vsel %vm365_vm2, %v1541_v53, %v1546_v60 }
  0xd9   : > { %v367_v7 = vsel %vm365_vm2, %v1542_v52, %v1547_v59  ;;  %v381_v9 = vpop.permute.xlu1 %380  ;;  %v1387_v11 = vpack.c.bf16 %v371_v63, %v370_v62 }
  0xda   : > { %1386 = vmatprep.subr.bf16.mxu0 %v1385_v58  ;;  %v1421_v12 = vpack.c.bf16 %v367_v7, %v366_v6 }
  0xdb   : > { %1388 = vmatpush1.bf16.msra.mxu0 %v1387_v11 }
  0xdc   : > { %v383_v10 = vpop.permute.xlu0 %382  ;;  %1422 = vmatpush1.bf16.msra.mxu1 %v1421_v12 }
  0xdd   : > { %v393_v14 = vsel %vm390_vm3, %v379_v57, %v383_v10  ;;  %1423 = vmatprep.subr.bf16.mxu1 %v1726_v1  ;;  %v385_v16 = vpop.permute.xlu1 %384 }
  0xde   : > { %v394_v21 = vsel %vm390_vm3, %v381_v9, %v385_v16  ;;  %v414_v27 = vmul.f32 %v2087_v13, %v393_v14 }
  0xdf   : > { %v417_v29 = vmul.f32 %v2087_v13, %v394_v21  ;;  %v1399_v21 = vpack.c.bf16 %v1942_v5, %v1934_v3 }
  0xe0   : > { %v1550_v17 = vpop.permute.xlu0 %1549 }
  0xe1   : > { %v1552_v22 = vunpack.i.h.bf16 %v1550_v17  ;;  %v1551_v26 = vunpack.i.l.bf16 %v1550_v17  ;;  %v426_v35 = vpop.permute.xlu1 %425  ;;  %v1389_v37 = vpack.c.bf16 %v417_v29, %v414_v27 }
  0xe3   : > { %v392_v31 = vsel %vm390_vm3, %v385_v16, %v1552_v22  ;;  %v396_v32 = vsel %vm390_vm3, %v1552_v22, %v381_v9  ;;  %v391_v33 = vsel %vm390_vm3, %v383_v10, %v1551_v26  ;;  %v395_v34 = vsel %vm390_vm3, %v1551_v26, %v379_v57  ;;  %1390 = vmatprep.subr.bf16.mxu0 %v1389_v37 }
  0xe4   : > { %v428_v36 = vpop.permute.xlu0 %427  ;;  %v413_v38 = vmul.f32 %v2093_v15, %v395_v34  ;;  %v416_v39 = vmul.f32 %v2093_v15, %v396_v32  ;;  %v415_v40 = vmul.f32 %v2096_v19, %v391_v33  ;;  %v418_v41 = vmul.f32 %v2096_v19, %v392_v31 }
  0xe5   : > { %v430_v44 = vpop.permute.xlu1 %429 }
  0xe6   : > { %v1391_v42 = vpack.c.bf16 %v416_v39, %v413_v38  ;;  %v1424_v43 = vpack.c.bf16 %v418_v41, %v415_v40  ;;  %v440_v46 = vsel %vm437_vm4, %v426_v35, %v430_v44 }
  0xe7   : > { %v445_v48 = vmul.f32 %v440_v46, %v2050_v30 }
  0xe8   : > { %v432_v45 = vpop.permute.xlu0 %431  ;;  %1392 = vmatpush1.bf16.msra.mxu0 %v1391_v42  ;;  %1425 = vmatpush1.bf16.msra.mxu1 %v1424_v43 }
  0xe9   : > { %v441_v47 = vsel %vm437_vm4, %v428_v36, %v432_v45  ;;  %1426 = vmatprep.subr.bf16.mxu1 %v1726_v1  ;;  %v1555_v50 = vpop.permute.xlu1 %1554 }
  0xea   : > { %v448_v49 = vmul.f32 %v441_v47, %v2050_v30  ;;  %v1557_v53 = vunpack.i.h.bf16 %v1555_v50  ;;  %v1556_v54 = vunpack.i.l.bf16 %v1555_v50 }
  0xec   : > { %v467_v51 = vpop.permute.xlu0 %466  ;;  %v1393_v52 = vpack.c.bf16 %v448_v49, %v445_v48  ;;  %v438_v55 = vsel %vm437_vm4, %v430_v44, %v1556_v54  ;;  %v439_v56 = vsel %vm437_vm4, %v432_v45, %v1557_v53  ;;  %v442_v57 = vsel %vm437_vm4, %v1556_v54, %v426_v35 }
  0xed   : > { %v443_v58 = vsel %vm437_vm4, %v1557_v53, %v428_v36  ;;  %v469_v59 = vpop.permute.xlu1 %468  ;;  %v444_v61 = vmul.f32 %v442_v57, %v2045_v28  ;;  %v446_v63 = vmul.f32 %v438_v55, %v2042_v25  ;;  %v449_v6 = vmul.f32 %v439_v56, %v2042_v25 }
  0xee   : > { %1394 = vmatprep.subr.bf16.mxu0 %v1393_v52  ;;  %v447_v62 = vmul.f32 %v443_v58, %v2045_v28 }
  0xef   : > { %v1427_v11 = vpack.c.bf16 %v449_v6, %v446_v63 }
  0xf0   : > { %v1560_v60 = vpop.permute.xlu0 %1559  ;;  %v1395_v10 = vpack.c.bf16 %v447_v62, %v444_v61 }
  0xf1   : > { %v1562_v7 = vunpack.i.h.bf16 %v1560_v60  ;;  %v1561_v9 = vunpack.i.l.bf16 %v1560_v60  ;;  %v463_v16 = vpop.permute.xlu1 %462  ;;  %1428 = vmatpush1.bf16.msra.mxu1 %v1427_v11 }
  0xf2   : > { %1396 = vmatpush1.bf16.msra.mxu0 %v1395_v10  ;;  %v477_v27 = vsel %vm474_vm5, %v463_v16, %v467_v51  ;;  %1429 = vmatprep.subr.bf16.mxu1 %v1726_v1 }
  0xf3   : > { %v476_v12 = vsel %vm474_vm5, %v469_v59, %v1562_v7  ;;  %v475_v14 = vsel %vm474_vm5, %v467_v51, %v1561_v9  ;;  %v479_v29 = vsel %vm474_vm5, %v1561_v9, %v463_v16  ;;  %1398 = vmatprep.subr.bf16.mxu0 %v1397_v8  ;;  %v481_v3 = vmul.f32 %v477_v27, %v2093_v15 }
  0xf4   : > { %v465_v17 = vpop.permute.xlu0 %464  ;;  %v482_v22 = vmul.f32 %v475_v14, %v2087_v13  ;;  %v485_v26 = vmul.f32 %v476_v12, %v2087_v13  ;;  %v483_v5 = vmul.f32 %v479_v29, %v2096_v19 }
  0xf5   : > { %v478_v31 = vsel %vm474_vm5, %v465_v17, %v469_v59  ;;  %v480_v32 = vsel %vm474_vm5, %v1562_v7, %v465_v17  ;;  %v498_v36 = vpop.permute.xlu1 %497  ;;  %1430 = vmatpush1.bf16.msra.mxu1 %v1726_v1 }
  0xf6   : > { %v484_v33 = vmul.f32 %v478_v31, %v2093_v15  ;;  %v486_v34 = vmul.f32 %v480_v32, %v2096_v19  ;;  %v1401_v35 = vpack.c.bf16 %v485_v26, %v482_v22  ;;  %1400 = vmatpush1.bf16.msra.mxu0 %v1399_v21  ;;  %1431 = vmatprep.subr.bf16.mxu1 %v1726_v1 }
  0xf8   : > { %v500_v37 = vpop.permute.xlu0 %499  ;;  %1402 = vmatprep.subr.bf16.mxu0 %v1401_v35  ;;  %v1403_v2 = vpack.c.bf16 %v484_v33, %v481_v3  ;;  %v1432_v4 = vpack.c.bf16 %v486_v34, %v483_v5 }
  0xf9   : > { %v1565_v8 = vpop.permute.xlu1 %1564 }
  0xfa   : > { %1404 = vmatpush1.bf16.msra.mxu0 %v1403_v2  ;;  %1433 = vmatpush1.bf16.msra.mxu1 %v1432_v4  ;;  %v1567_v39 = vunpack.i.h.bf16 %v1565_v8  ;;  %v1566_v40 = vunpack.i.l.bf16 %v1565_v8 }
  0xfb   : > { %1434 = vmatprep.subr.bf16.mxu1 %v1726_v1 }
  0xfc   : > { %v494_v38 = vpop.permute.xlu0 %493  ;;  %v506_v42 = vsel %vm505_vm6, %v498_v36, %v1566_v40  ;;  %v507_v43 = vsel %vm505_vm6, %v500_v37, %v1567_v39 }
  0xfd   : > { %v508_v41 = vsel %vm505_vm6, %v494_v38, %v498_v36  ;;  %v510_v44 = vsel %vm505_vm6, %v1566_v40, %v494_v38  ;;  %v496_v45 = vpop.permute.xlu1 %495  ;;  %v513_v47 = vmul.f32 %v506_v42, %v2050_v30  ;;  %v516_v48 = vmul.f32 %v507_v43, %v2050_v30 }
  0xfe   : > { %v512_v49 = vmul.f32 %v508_v41, %v2045_v28  ;;  %v509_v50 = vsel %vm505_vm6, %v496_v45, %v500_v37  ;;  %v511_v51 = vsel %vm505_vm6, %v1567_v39, %v496_v45  ;;  %v514_v52 = vmul.f32 %v510_v44, %v2042_v25  ;;  %v580_v44 = vld [vmem:[#allocation7] sm:$0xff]  ;;  %v583_v45 = vld [vmem:[#allocation7 + $0x18] sm:$0xff] }
  0xff   : > { %v515_v53 = vmul.f32 %v509_v50, %v2045_v28  ;;  %v517_v54 = vmul.f32 %v511_v51, %v2042_v25  ;;  %v1405_v55 = vpack.c.bf16 %v516_v48, %v513_v47  ;;  %v585_v47 = vld [vmem:[#allocation7 + $0x28] sm:$0xff]  ;;  %v587_v48 = vld [vmem:[#allocation7 + $0x38] sm:$0xff] }
 0x100   : > { %v1570_v46 = vpop.permute.xlu0 %1569 }
 0x101   : > { %v1572_v56 = vunpack.i.h.bf16 %v1570_v46  ;;  %v1571_v57 = vunpack.i.l.bf16 %v1570_v46  ;;  %v1575_v58 = vpop.permute.xlu1 %1574  ;;  %1406 = vmatprep.subr.bf16.mxu0 %v1405_v55  ;;  %v1407_v60 = vpack.c.bf16 %v515_v53, %v512_v49  ;;  %v1435_v61 = vpack.c.bf16 %v517_v54, %v514_v52  ;;  %v582_v46 = vld [vmem:[#allocation7 + $0x10] sm:$0xff]  ;;  %v1342_v55 = vld [vmem:[%s2385_s5 + $0x2] ss:$4 sm:$0x7] }
 0x102   : > { %v1577_v62 = vunpack.i.h.bf16 %v1575_v58  ;;  %v1576_v63 = vunpack.i.l.bf16 %v1575_v58  ;;  %v586_v49 = vld [vmem:[#allocation7 + $0x30] sm:$0xff] }
 0x103   : > { %1408 = vmatpush1.bf16.msra.mxu0 %v1407_v60  ;;  %1436 = vmatpush1.bf16.msra.mxu1 %v1435_v61  ;;  %v871_v61 = vrot.slane %v1342_v55, %v2036_v23 }
 0x104   : > { %v1580_v59 = vpop.permute.xlu0 %1579  ;;  %1437 = vmatprep.subr.bf16.mxu1 %v1726_v1  ;;  %v537_v25 = vsel %vm536_vm7, %v1571_v57, %v1576_v63  ;;  %v538_v9 = vsel %vm536_vm7, %v1572_v56, %v1577_v62 }
 0x105   : > { %v1582_v6 = vunpack.i.h.bf16 %v1580_v59  ;;  %v1581_v7 = vunpack.i.l.bf16 %v1580_v59  ;;  %v554_v12 = vpop.permute.xlu1 %553  ;;  %v1409_v16 = vpack.c.bf16 %v538_v9, %v537_v25 }
 0x107   : > { %v541_v10 = vsel %vm536_vm7, %v1576_v63, %v1581_v7  ;;  %v542_v11 = vsel %vm536_vm7, %v1577_v62, %v1582_v6  ;;  %v539_v21 = vsel %vm536_vm7, %v1581_v7, %v1571_v57  ;;  %v540_v22 = vsel %vm536_vm7, %v1582_v6, %v1572_v56  ;;  %1410 = vmatprep.subr.bf16.mxu0 %v1409_v16 }
 0x108   : > { %v556_v14 = vpop.permute.xlu0 %555  ;;  %v1438_v17 = vpack.c.bf16 %v542_v11, %v541_v10  ;;  %v1411_v26 = vpack.c.bf16 %v540_v22, %v539_v21  ;;  %v879_v63 = vrot.slane %v1342_v55, %v2031_v20  ;;  %v875_v7 = vrot.slane %v1342_v55, %v2039_v24 }
 0x109   : > { %v1585_v27 = vpop.permute.xlu1 %1584 }
 0x10a   : > { %1439 = vmatpush1.bf16.msra.mxu1 %v1438_v17  ;;  %1412 = vmatpush1.bf16.msra.mxu0 %v1411_v26  ;;  %v1587_v31 = vunpack.i.h.bf16 %v1585_v27  ;;  %v1586_v32 = vunpack.i.l.bf16 %v1585_v27 }
 0x10b   : > { %1440 = vmatprep.subr.bf16.mxu1 %v1726_v1 }
 0x10c   : > { %v550_v29 = vpop.permute.xlu0 %549  ;;  %v562_v5 = vsel %vm561_vm8, %v554_v12, %v1586_v32  ;;  %v563_v33 = vsel %vm561_vm8, %v556_v14, %v1587_v31 }
 0x10d   : > { %v564_v3 = vsel %vm561_vm8, %v550_v29, %v554_v12  ;;  %v566_v34 = vsel %vm561_vm8, %v1586_v32, %v550_v29  ;;  %v552_v35 = vpop.permute.xlu1 %551  ;;  %v569_v36 = vmul.f32 %v562_v5, %v2087_v13  ;;  %v572_v37 = vmul.f32 %v563_v33, %v2087_v13 }
 0x10e   : > { %v568_v2 = vmul.f32 %v564_v3, %v2093_v15  ;;  %v565_v4 = vsel %vm561_vm8, %v552_v35, %v556_v14  ;;  %v567_v8 = vsel %vm561_vm8, %v1587_v31, %v552_v35  ;;  %v570_v38 = vmul.f32 %v566_v34, %v2096_v19 }
 0x10f   : > { %v571_v39 = vmul.f32 %v565_v4, %v2093_v15  ;;  %v573_v40 = vmul.f32 %v567_v8, %v2096_v19  ;;  %v1413_v41 = vpack.c.bf16 %v572_v37, %v569_v36  ;;  %v584_v19 = vld [vmem:[#allocation7 + $0x20] sm:$0xff] }
 0x111   : > { %1414 = vmatprep.subr.bf16.mxu0 %v1413_v41  ;;  %v1415_v42 = vpack.c.bf16 %v571_v39, %v568_v2  ;;  %v1441_v43 = vpack.c.bf16 %v573_v40, %v570_v38 }
 0x113   : > { %1416 = vmatpush1.bf16.msra.mxu0 %v1415_v42  ;;  %1442 = vmatpush1.bf16.msra.mxu1 %v1441_v43 }
 0x114   : > { %1451 = vmatprep.subr.bf16.mxu1 %v1726_v1 }
 0x116   : > { %744 = vmatmul.mubr.f32.vlgmr.msra.gmra.mrb[0].mxu0 %v580_v44  ;;  %833 = vmatmul.mubr.f32.vlgmr.msra.gmra.mrb[0].mxu1 %v580_v44 }
 0x117   : > { %1335 = vmatprep.mubr.msk.f32.mxu0 %vm666_vm0, %v583_v45  ;;  %1339 = vmatprep.mubr.msk.f32.mxu1 %vm666_vm0, %v583_v45 }
 0x11a   : > { %750 = vmatmul.mubr.f32.gmra.mrb[2].mxu0 %v582_v46  ;;  %838 = vmatmul.mubr.f32.gmra.mrb[2].mxu1 %v582_v46 }
 0x11b   : > { %1336 = vmatprep.mubr.msk.f32.mxu0 %vm666_vm0, %v585_v47  ;;  %1340 = vmatprep.mubr.msk.f32.mxu1 %vm666_vm0, %v585_v47 }
 0x11d   : > { %v649_v50 = vpop.permute.xlu0 %648 }
 0x11e   : > { %756 = vmatmul.mubr.f32.gmra.mrb[4].mxu0 %v584_v19  ;;  %843 = vmatmul.mubr.f32.gmra.mrb[4].mxu1 %v584_v19  ;;  %v654_v51 = vpop.permute.xlu1 %653 }
 0x11f   : > { %1337 = vmatprep.mubr.msk.f32.mxu0 %vm666_vm0, %v587_v48  ;;  %1341 = vmatprep.mubr.msk.f32.mxu1 %vm666_vm0, %v587_v48 }
 0x121   : > { %v664_v37 = vpop.permute.xlu0 %663 }
 0x122   : > { %762 = vmatmul.mubr.f32.gmra.mrb[6].mxu0 %v586_v49  ;;  %848 = vmatmul.mubr.f32.gmra.mrb[6].mxu1 %v586_v49  ;;  %v659_v17 = vpop.permute.xlu1 %658 }
 0x123   : > { %972 = vmatprep.mubr.f32.mxu0 %v1724_v0  ;;  %1372 = vmatprep.mubr.msk.f32.mxu1 %vm1735_vm9, %v1724_v0 }
 0x1e9   : > { %v834_v52 = vpop.f32.mrb[0].mxu1  ;;  %v745_v53 = vpop.f32.mrb[0].mxu0 }
 0x1ea   : > { %v835_v54 = vadd.f32 %v834_v52, %v649_v50  ;;  %v836_v56 = vpop.f32.mrb[1].mxu1  ;;  %v746_v57 = vadd.f32 %v745_v53, %v649_v50  ;;  %v747_v58 = vpop.f32.mrb[1].mxu0 }
 0x1eb   : > { %v748_v59 = vadd.f32 %v747_v58, %v649_v50 }
 0x1ec   : > { %v853_v60 = vmax.f32 %v746_v57, 0.0  ;;  %v855_v62 = vmax.f32 %v835_v54, 0.0 }
 0x1ed   : > { %v854_v6 = vmax.f32 %v748_v59, 0.0  ;;  %v751_v25 = vpop.f32.mrb[2].mxu0  ;;  %v839_v9 = vpop.f32.mrb[2].mxu1  ;;  %v895_v59 = vld [vmem:[%s2383_s3] sm:$0xff] }
 0x1ee   : > { %v752_v10 = vadd.f32 %v751_v25, %v654_v51  ;;  %v840_v11 = vadd.f32 %v839_v9, %v654_v51  ;;  %v753_v12 = vpop.f32.mrb[3].mxu0  ;;  %v841_v14 = vpop.f32.mrb[3].mxu1  ;;  %v883_v21 = vmul.f32 %v871_v61, %v853_v60  ;;  %v885_v27 = vmul.f32 %v879_v63, %v855_v62  ;;  %v897_v60 = vld [vmem:[%s2383_s3 + $0x10] sm:$0x3] }
 0x1ef   : > { %v754_v16 = vadd.f32 %v753_v12, %v654_v51  ;;  %v884_v29 = vmul.f32 %v875_v7, %v854_v6 }
 0x1f0   : > { %v856_v22 = vmax.f32 %v752_v10, 0.0  ;;  %v858_v26 = vmax.f32 %v840_v11, 0.0 }
 0x1f1   : > { %v857_v23 = vmax.f32 %v754_v16, 0.0  ;;  %v757_v31 = vpop.f32.mrb[4].mxu0  ;;  %v844_v32 = vpop.f32.mrb[4].mxu1 }
 0x1f2   : > { %v886_v20 = vmul.f32 %v871_v61, %v856_v22  ;;  %v888_v3 = vmul.f32 %v879_v63, %v858_v26  ;;  %v758_v5 = vadd.f32 %v757_v31, %v659_v17  ;;  %v845_v24 = vadd.f32 %v844_v32, %v659_v17  ;;  %v759_v33 = vpop.f32.mrb[5].mxu0  ;;  %v846_v34 = vpop.f32.mrb[5].mxu1 }
 0x1f3   : > { %v887_v35 = vmul.f32 %v875_v7, %v857_v23  ;;  %v760_v36 = vadd.f32 %v759_v33, %v659_v17 }
 0x1f4   : > { %v1445_v2 = vpack.c.bf16 %v886_v20, %v883_v21  ;;  %v1452_v4 = vpack.c.bf16 %v888_v3, %v885_v27  ;;  %v859_v40 = vmax.f32 %v758_v5, 0.0  ;;  %v861_v41 = vmax.f32 %v845_v24, 0.0 }
 0x1f5   : > { %v763_v8 = vpop.f32.mrb[6].mxu0  ;;  %v849_v38 = vpop.f32.mrb[6].mxu1  ;;  %v1443_v39 = vpack.c.bf16 %v887_v35, %v884_v29  ;;  %v860_v46 = vmax.f32 %v760_v36, 0.0 }
 0x1f6   : > { %v764_v42 = vadd.f32 %v763_v8, %v664_v37  ;;  %v850_v43 = vadd.f32 %v849_v38, %v664_v37  ;;  %v765_v44 = vpop.f32.mrb[7].mxu0  ;;  %v851_v45 = vpop.f32.mrb[7].mxu1  ;;  %1453 = vmatpush3.bf16.msra.mxu1 %v1452_v4  ;;  %v889_v50 = vmul.f32 %v871_v61, %v859_v40  ;;  %v891_v51 = vmul.f32 %v879_v63, %v861_v41 }
 0x1f7   : > { %v766_v47 = vadd.f32 %v765_v44, %v664_v37  ;;  %1444 = vmatprep.subr.bf16.mxu0 %v1443_v39  ;;  %1454 = vmatprep.subr.bf16.mxu1 %v1726_v1  ;;  %v890_v54 = vmul.f32 %v875_v7, %v860_v46  ;;  %v896_v1 = vld [vmem:[%s2383_s3 + $0x8] sm:$0xff]  ;;  %v2281_v37 = vpop.permute.xlu1 %1210 }
 0x1f8   : > { %v862_v19 = vmax.f32 %v764_v42, 0.0  ;;  %v864_v48 = vmax.f32 %v850_v43, 0.0  ;;  %1446 = vmatpush1.bf16.msra.mxu0 %v1445_v2 }
 0x1f9   : > { %v863_v49 = vmax.f32 %v766_v47, 0.0 }
 0x1fa   : > { %v892_v52 = vmul.f32 %v871_v61, %v862_v19  ;;  %v894_v53 = vmul.f32 %v879_v63, %v864_v48 }
 0x1fb   : > { %v893_v55 = vmul.f32 %v875_v7, %v863_v49 }
 0x1fc   : > { %v1449_v56 = vpack.c.bf16 %v892_v52, %v889_v50  ;;  %v1455_v57 = vpack.c.bf16 %v894_v53, %v891_v51 }
 0x1fd   : > { %v1447_v58 = vpack.c.bf16 %v893_v55, %v890_v54 }
 0x1fe   : > { %1456 = vmatpush3.bf16.msra.mxu1 %v1455_v57 }
 0x1ff   : > { %1448 = vmatprep.subr.bf16.mxu0 %v1447_v58 }
 0x200   : > { %1450 = vmatpush1.bf16.msra.mxu0 %v1449_v56 }
 0x201   : > { %1373 = vmatmul.mubr.msk.f32.vlgmr.msra.gmra.mrb[8].mxu1 %vm898_vm10, %v895_v59 }
 0x202   : > { %1375 = vmatprep.mubr.msk.f32.mxu1 %vm1735_vm9, %v1724_v0 }
 0x203   : > { %1343 = vmatmul.mubr.msk.f32.vlgmr.msra.gmra.mrb[8].mxu0 %vm898_vm10, %v895_v59 }
 0x204   : > { %978 = vmatprep.mubr.f32.mxu0 %v1724_v0 }
 0x205   : > { %1376 = vmatmul.mubr.msk.f32.gmra.mrb[10].mxu1 %vm898_vm10, %v896_v1 }
 0x206   : > { %1378 = vmatprep.mubr.msk.f32.mxu1 %vm1735_vm9, %v1724_v0 }
 0x207   : > { %1344 = vmatmul.mubr.msk.f32.gmra.mrb[10].mxu0 %vm898_vm10, %v896_v1 }
 0x208   : > { %984 = vmatprep.mubr.f32.mxu0 %v1724_v0 }
 0x209   : > { %1379 = vmatmul.mubr.msk.f32.gmra.mrb[12].mxu1 %vm898_vm10, %v897_v60 }
 0x20b   : > { %1345 = vmatmul.mubr.msk.f32.gmra.mrb[12].mxu0 %vm898_vm10, %v897_v60 }
 0x2d4   : > { %v1057_v61 = vpop.f32.mrb[8].mxu1 }
 0x2d5   : > { %1075 = vrot.lane.b32.xlu1 %v1057_v61, %s1725_s29  ;;  %v1088_v62 = vrot.slane %v1057_v61, 2  ;;  %v1374_v63 = vpop.f32.mrb[9].mxu1  ;;  %v1104_v7 = vrot.slane %v1057_v61, 4  ;;  %v1122_v0 = vrot.slane %v1057_v61, 6 }
 0x2d6   : > { %v974_v6 = vpop.f32.mrb[8].mxu0 }
 0x2d7   : > { %1096 = vrot.lane.b32.xlu0 %v1088_v62, %s1727_s27  ;;  %v976_v25 = vpop.f32.mrb[9].mxu0  ;;  %v1102_v16 = vrot.slane %v974_v6, 4  ;;  %v1086_v26 = vrot.slane %v974_v6, 2  ;;  %v1120_v29 = vrot.slane %v974_v6, 6 }
 0x2d8   : > { %v1062_v9 = vpop.f32.mrb[10].mxu1  ;;  %v1087_v27 = vrot.slane %v976_v25, 2  ;;  %v1121_v23 = vrot.slane %v976_v25, 6  ;;  %v1103_v32 = vrot.slane %v976_v25, 4 }
 0x2d9   : > { %1112 = vrot.lane.b32.xlu1 %v1104_v7, %s1728_s20  ;;  %v1377_v10 = vpop.f32.mrb[11].mxu1  ;;  %v1145_v31 = vrot.slane %v1062_v9, 2  ;;  %v1163_v20 = vrot.slane %v1062_v9, 4  ;;  %v1181_v36 = vrot.slane %v1062_v9, 6 }
 0x2da   : > { %v2250_v11 = vpop.f32.mrb[10].mxu0 }
 0x2db   : > { %1130 = vrot.lane.b32.xlu0 %v1122_v0, %s1729_s26  ;;  %v2253_v12 = vpop.f32.mrb[11].mxu0  ;;  %v1143_v3 = vrot.slane %v2250_v11, 2  ;;  %v1161_v5 = vrot.slane %v2250_v11, 4  ;;  %v1179_v33 = vrot.slane %v2250_v11, 6 }
 0x2dc   : > { %v1067_v14 = vpop.f32.mrb[12].mxu1  ;;  %v1162_v24 = vrot.slane %v2253_v12, 4  ;;  %v1180_v34 = vrot.slane %v2253_v12, 6  ;;  %v1144_v35 = vrot.slane %v2253_v12, 2 }
 0x2dd   : > { %1071 = vrot.lane.b32.xlu1 %v974_v6, %s1725_s29  ;;  %v1380_v17 = vpop.f32.mrb[13].mxu1 }
 0x2de   : > { %v986_v21 = vpop.f32.mrb[12].mxu0 }
 0x2df   : > { %1073 = vrot.lane.b32.xlu0 %v976_v25, %s1725_s29  ;;  %v988_v22 = vpop.f32.mrb[13].mxu0  ;;  %s2405_s29 = smov 113  }
 0x2e1   : > { %1108 = vrot.lane.b32.xlu1 %v1102_v16, %s1728_s20 }
 0x2e3   : > { %1092 = vrot.lane.b32.xlu0 %v1086_v26, %s1727_s27 }
 0x2e5   : > { %1094 = vrot.lane.b32.xlu1 %v1087_v27, %s1727_s27  ;;  %s2406_s27 = smov 112  }
 0x2e7   : > { %1126 = vrot.lane.b32.xlu0 %v1120_v29, %s1729_s26 }
 0x2e9   : > { %1128 = vrot.lane.b32.xlu1 %v1121_v23, %s1729_s26  ;;  %s1356_s26 = sshll.u32 %s1793_s25, 6 }
 0x2ea   : > { %s2336_s15 = scalar_lea.hbm %s2386_s6, %s1356_s26 }
 0x2eb   : > { %1110 = vrot.lane.b32.xlu0 %v1103_v32, %s1728_s20  ;;  %s1332_s20 = sshll.u32 %s1917_s12, 2 }
 0x2ed   : > { %1153 = vrot.lane.b32.xlu1 %v1145_v31, %s1730_s19 }
 0x2ef   : > { %1171 = vrot.lane.b32.xlu0 %v1163_v20, %s2405_s29 }
 0x2f1   : > { %1149 = vrot.lane.b32.xlu1 %v1143_v3, %s1730_s19 }
 0x2f3   : > { %1167 = vrot.lane.b32.xlu0 %v1161_v5, %s2405_s29 }
 0x2f5   : > { %1169 = vrot.lane.b32.xlu1 %v1162_v24, %s2405_s29 }
 0x2f7   : > { %1185 = vrot.lane.b32.xlu0 %v1179_v33, %s2406_s27 }
 0x2f9   : > { %1187 = vrot.lane.b32.xlu1 %v1180_v34, %s2406_s27 }
 0x2fb   : > { %1151 = vrot.lane.b32.xlu0 %v1144_v35, %s1730_s19  ;;  %s284_s19 = scalar_lea.vmem [#allocation9], %s1332_s20 }
 0x2fd   : > { %1195 = vrot.lane.b32.xlu1 %v986_v21, %s1733_s30 }
 0x2ff   : > { %1189 = vrot.lane.b32.xlu0 %v1181_v36, %s2406_s27 }
 0x301   : > { %1199 = vrot.lane.b32.xlu1 %v1067_v14, %s1733_s30 }
 0x303   : > { %1197 = vrot.lane.b32.xlu0 %v988_v22, %s1733_s30  ;;  %s1242_s30 = sshll.u32 %s284_s19, 4  ;;  %s2338_s30 = int_to_ptr.vmem [resolvable:$true] %s1242_s30 }
 0x304   : > { %s1648_s25 = scalar_lea.vmem %s2338_s30, 64  ;;  %p1655_p10 = scmp.lt.s32.totalorder %s2338_s30, %s1653_s17 }
 0x305   : > { %p1649_p4 = scmp.ne.s32.totalorder %s2338_s30, %s1648_s25  ;;  %p1656_p13 = scmp.lt.s32.totalorder %s1654_s10, %s1648_s25 }
 0x307   : > { %p1650_p6 = pnand %p1649_p4, %p1866_p12  ;;  %p1657_p3 = por %p1656_p13, %p1655_p10 }
 0x309   : > { %p1651_p8 = pneg %p1650_p6 }
 0x30b   : > { %p1658_p7 = pnand %p1657_p3, %p1651_p8 }
 0x347   : > { %v1076_v2 = vpop.permute.xlu1 %1075 }
 0x349   : > { %v1097_v4 = vpop.permute.xlu0 %1096 }
 0x34b   : > { %v1113_v8 = vpop.permute.xlu1 %1112 }
 0x34d   : > { %v1131_v38 = vpop.permute.xlu0 %1130 }
 0x34f   : > { %v1072_v39 = vpop.permute.xlu1 %1071 }
 0x350   : > { %v1078_v19 = vsel %vm318_vm1, %v1076_v2, %v1072_v39 }
 0x351   : > { %v1074_v40 = vpop.permute.xlu0 %1073  ;;  %v1079_v53 = vmul.f32 %v1078_v19, %v2045_v28 }
 0x352   : > { %v1077_v48 = vsel %vm318_vm1, %v1072_v39, %v1074_v40 }
 0x353   : > { %v1109_v41 = vpop.permute.xlu1 %1108  ;;  %v1080_v54 = vmul.f32 %v1077_v48, %v2050_v30 }
 0x354   : > { %v1115_v57 = vsel %vm390_vm3, %v1113_v8, %v1109_v41 }
 0x355   : > { %v1093_v42 = vpop.permute.xlu0 %1092  ;;  %v1116_v62 = vmul.f32 %v1115_v57, %v2093_v15 }
 0x356   : > { %v1099_v51 = vsel %vm365_vm2, %v1097_v4, %v1093_v42 }
 0x357   : > { %v1095_v43 = vpop.permute.xlu1 %1094  ;;  %v1100_v59 = vadd.f32 %v1099_v51, %v1079_v53 }
 0x358   : > { %v1098_v52 = vsel %vm365_vm2, %v1093_v42, %v1095_v43 }
 0x359   : > { %v1127_v44 = vpop.permute.xlu0 %1126  ;;  %v1101_v1 = vadd.f32 %v1098_v52, %v1080_v54  ;;  %v1118_v25 = vadd.f32 %v1116_v62, %v1100_v59 }
 0x35a   : > { %v1133_v58 = vsel %vm437_vm4, %v1131_v38, %v1127_v44 }
 0x35b   : > { %v1129_v45 = vpop.permute.xlu1 %1128  ;;  %v1134_v63 = vmul.f32 %v1133_v58, %v2045_v28 }
 0x35c   : > { %v1132_v61 = vsel %vm437_vm4, %v1127_v44, %v1129_v45 }
 0x35d   : > { %v1111_v46 = vpop.permute.xlu0 %1110  ;;  %v1135_v9 = vmul.f32 %v1132_v61, %v2050_v30  ;;  %v1136_v10 = vadd.f32 %v1134_v63, %v1118_v25 }
 0x35e   : > { %v1114_v49 = vsel %vm390_vm3, %v1109_v41, %v1111_v46 }
 0x35f   : > { %v1154_v47 = vpop.permute.xlu1 %1153  ;;  %v1117_v55 = vmul.f32 %v1114_v49, %v2087_v13  ;;  %v1138_v29 = vadd.f32 %v1136_v10, %v2250_v11 }
 0x361   : > { %v1172_v50 = vpop.permute.xlu0 %1171  ;;  %v1119_v6 = vadd.f32 %v1117_v55, %v1101_v1 }
 0x363   : > { %v1150_v56 = vpop.permute.xlu1 %1149  ;;  %v1137_v14 = vadd.f32 %v1135_v9, %v1119_v6 }
 0x365   : > { %v1168_v60 = vpop.permute.xlu0 %1167  ;;  %v1139_v23 = vadd.f32 %v1137_v14, %v2253_v12 }
 0x367   : > { %v1170_v7 = vpop.permute.xlu1 %1169 }
 0x368   : > { %v1173_v21 = vsel %vm505_vm6, %v1170_v7, %v1172_v50  ;;  %v1174_v22 = vsel %vm505_vm6, %v1168_v60, %v1170_v7 }
 0x369   : > { %v1186_v0 = vpop.permute.xlu0 %1185  ;;  %v1175_v3 = vmul.f32 %v1174_v22, %v2045_v28  ;;  %v1176_v5 = vmul.f32 %v1173_v21, %v2050_v30 }
 0x36b   : > { %v1188_v16 = vpop.permute.xlu1 %1187 }
 0x36c   : > { %v1192_v12 = vsel %vm536_vm7, %v1186_v0, %v1188_v16 }
 0x36d   : > { %v1152_v17 = vpop.permute.xlu0 %1151 }
 0x36e   : > { %v1155_v26 = vsel %vm474_vm5, %v1152_v17, %v1154_v47  ;;  %v1156_v27 = vsel %vm474_vm5, %v1150_v56, %v1152_v17 }
 0x36f   : > { %v1157_v31 = vmul.f32 %v1156_v27, %v2093_v15  ;;  %v1158_v32 = vmul.f32 %v1155_v26, %v2087_v13  ;;  %v1196_v20 = vpop.permute.xlu1 %1195 }
 0x371   : > { %v1159_v24 = vadd.f32 %v1157_v31, %v1138_v29  ;;  %v1160_v33 = vadd.f32 %v1158_v32, %v1139_v23  ;;  %v1190_v34 = vpop.permute.xlu0 %1189 }
 0x372   : > { %v1191_v4 = vsel %vm536_vm7, %v1188_v16, %v1190_v34 }
 0x373   : > { %v1177_v35 = vadd.f32 %v1175_v3, %v1159_v24  ;;  %v1178_v36 = vadd.f32 %v1176_v5, %v1160_v33  ;;  %v1200_v2 = vpop.permute.xlu1 %1199 }
 0x375   : > { %v1198_v11 = vpop.permute.xlu0 %1197  ;;  %v1194_v8 = vadd.f32 %v1191_v4, %v1178_v36  ;;  %v1193_v38 = vadd.f32 %v1192_v12, %v1177_v35 }
 0x376   : > { %v1201_v28 = vsel %vm561_vm8, %v1198_v11, %v1200_v2  ;;  %v1202_v30 = vsel %vm561_vm8, %v1196_v20, %v1198_v11 }
 0x377   : > { %v1203_v39 = vmul.f32 %v1202_v30, %v2093_v15  ;;  %v1204_v40 = vmul.f32 %v1201_v28, %v2087_v13 }
 0x379   : > { %v1205_v41 = vadd.f32 %v1203_v39, %v1193_v38  ;;  %v1206_v42 = vadd.f32 %v1204_v40, %v1194_v8 }
 0x37b   : > { %v1213_v43 = vadd.f32 %v2281_v37, %v1205_v41  ;;  %v1214_v44 = vadd.f32 %v2281_v37, %v1206_v42 }
 0x37d   : > { %v1217_v45 = vcombine.low %v1213_v43, %v1214_v44 }
 0x37f   : > { %1349 = vst.sshfl [vmem:[%s284_s19] sm:$0x33 pattern:$0x76325410] %v1217_v45 }
 0x380   : > { %1661 = shalt.err (!%p1658_p7)
}
 0x381   : > { %s1662_s12 = scalar_lea.hbm %s2336_s15, 64  ;;  %s1666_s27 = scalar_lea.hbm %s2386_s6, 128 }
 0x382   : > { %p1663_p9 = scmp.ne.s32.totalorder %s2336_s15, %s1662_s12  ;;  %p1667_p5 = scmp.lt.u32.totalorder %s2336_s15, %s2386_s6 }
 0x383   : > { %p1668_p2 = scmp.lt.u32.totalorder %s1666_s27, %s1662_s12  ;;  %p1670_p4 = scmp.lt.u32.totalorder %s1662_s12, %s2336_s15 }
 0x384   : > { %p1664_p1 = pnand %p1663_p9, %p1866_p12 }
 0x385   : > { %p1669_p11 = por %p1668_p2, %p1667_p5 }
 0x386   : > { %p1665_p0 = pneg %p1664_p1 }
 0x387   : > { %p1671_p6 = por %p1670_p4, %p1669_p11 }
 0x389   : > { %p1672_p8 = pnand %p1671_p6, %p1665_p0 }
 0x38b   : > { %1675 = shalt.err (!%p1672_p8)
}
 0x38c   : > { %1463 = dma.vmem_to_hbm [thread:$0]  (%p1866_p12), %s2338_s30, 64, %s2336_s15, %s1228_s16  }
 0x38d PF: > { %s1254_s19 = sand.u32 1, %s1706_s21   ;;  %p2407_p10 = scmp.ne.s32.totalorder %s2395_s28, 0 }
 0x38e   : > { %p2408_p13 = scmp.ge.s32.totalorder %s1718_s24, 2  ;;  %s1255_s7 = scalar_lea.sflag [#allocation6], %s1254_s19 }
 0x390   : > { %p1474_p3 = pnand %p2408_p13, %p2407_p10 }
 0x392   : > { %1701 = dma.done.wait (!%p1474_p3), %s1255_s7, 64  }
 0x393   : > { %1703 = vsyncadd (!%p1474_p3), %s1255_s7, 4294967232  ;;  %p20_p7 = scmp.ge.s32.totalorder %s1828_s9, 4   ;;  %s2409_s21 = smov %s1710_s22 }
 0x394   : > { %s2410_s22 = smov %s1714_s23  ;;  %s2411_s23 = smov %s1862_s13 }
 0x395   : > { %s2412_s24 = smov %s1828_s9  ;;  %22 = sbr.rel (!%p20_p7) target bundleno = 6 (0x6), region = 95 }
 0x39c   :  { %1260 = vsyncpa [#allocation5], 1 }
 0x39d   :  { %1262 = vsyncpa [#allocation5 + $0x1], 1 }
 0x39e   :  { %1263 = vsyncpa [#allocation8], 1 }
 0x39f   :  { %1264 = vsyncpa [#allocation6], 1 }
 0x3a0   :  { %1266 = vsyncpa [#allocation6 + $0x1], 1 }

</bundles_post_ra>
